<compile_context>
chip_gen: v7x
topology: tpu7x:2x2x1
jax: 0.10.0
libtpu: 0.0.40
codegen_flags: <defaults>
</compile_context>

<pallas_src>
import jax
import jax.numpy as jnp
from jax import lax
from jax.experimental import pallas as pl
from jax.experimental.pallas import tpu as pltpu


def _tmlp_kernel(x_ref, a_ref, wbc_ref, bias_ref, o_ref, t_ref):
    """One batch-block of the Tucker mode-product MLP.

    x_ref    : (bn, F, F*F)   bf16  -- (n, i, (j,k)); F*F lane-dense
    a_ref    : (O, F)         bf16  -- A.weight
    wbc_ref  : (F*F, OOp)     bf16  -- (B (x) C)^T, OO zero-padded to OOp lanes
    bias_ref : (O, OOp)       f32
    o_ref    : (bn, O, OOp)   f32   -- (n, a, (b,c)) with lane padding
    t_ref    : (bn*O, F*F)    f32   -- VMEM scratch for the mode-1 result
    """
    A = a_ref[...]                       # (O, F)       bf16
    Wbc = wbc_ref[...]                   # (F*F, OOp)   bf16
    bias = bias_ref[...]                 # (O, OOp)     f32

    bn = x_ref.shape[0]
    O = A.shape[0]
    OOp = Wbc.shape[1]

    # Mode-1 (i) contraction: per-sample canonical [O,F] x [F,F*F] matmuls,
    # f32 accumulation, staged into t_ref.  fori_loop keeps register pressure
    # bounded for large bn; unroll only small trip counts.
    def mode1(n, carry):
        row = n * O
        if O % 8 == 0:                   # static: keep stores sublane-aligned
            row = pl.multiple_of(row, 8)
        t_ref[pl.ds(row, O), :] = jnp.dot(
            A, x_ref[n], preferred_element_type=jnp.float32)
        return carry

    lax.fori_loop(0, bn, mode1, 0, unroll=bn <= 8)

    # Modes 2+3 ((j,k)) folded into ONE canonical matmul:
    # [bn*O, F*F] x [F*F, OOp] -> rows (n, a), lanes (b, c) (lane-dense).
    Y = jnp.dot(t_ref[...].astype(Wbc.dtype), Wbc,
                preferred_element_type=jnp.float32)

    # (bn*O, OOp) -> (bn, O, OOp) is layout-free when O % 8 == 0 (f32 sublane
    # tile); for other O it is only a cheap relayout, never a correctness bug.
    Y = Y.reshape(bn, O, OOp) + bias[None, :, :]
    o_ref[...] = Y.astype(o_ref.dtype)


def tmlp_block(x, A, B, C, bias, *, block_n=128, compute_dtype=jnp.bfloat16):
    """out[n,a,b,c] = sum_{ijk} A[a,i] B[b,j] C[c,k] x[n,i,j,k] + bias[a,b,c]."""
    N, F, _, _ = x.shape
    O = A.shape[0]
    FF, OO = F * F, O * O
    OOp = ((OO + 127) // 128) * 128      # pad output lanes to a multiple of 128
    out_dtype = x.dtype

    # Batch block: big enough to amortize per-step overhead and fill MXU M;
    # ragged tail handled by a cdiv grid (no full-array pad copy).
    bn = max(1, min(block_n, N))
    grid = pl.cdiv(N, bn)

    # Wrapper-side layout plumbing (run this whole function under jit so the
    # Kronecker precompute / casts are materialized once per compilation).
    x3 = x.reshape(N, F, FF).astype(compute_dtype)          # (n, i, (j,k))
    A_c = A.astype(compute_dtype)
    wbc = jnp.einsum('bj,ck->jkbc', B, C).reshape(FF, OO)   # (B (x) C)^T
    wbc = jnp.pad(wbc, ((0, 0), (0, OOp - OO))).astype(compute_dtype)
    bias2 = jnp.pad(bias.reshape(O, OO).astype(jnp.float32),
                    ((0, 0), (0, OOp - OO)))

    # Size the scoped-VMEM request from the actual per-step footprint
    # (double-buffered x / out blocks + scratch + constants) with headroom,
    # capped well below v7x's 64 MiB physical VMEM.
    isz = jnp.dtype(compute_dtype).itemsize
    vmem_need = (2 * bn * F * FF * isz          # x block (double-buffered)
                 + 2 * bn * O * OOp * 4          # out block (double-buffered)
                 + bn * O * FF * 4               # t_ref scratch
                 + 2 * (O * F * isz + FF * OOp * isz + O * OOp * 4))
    vmem_limit = int(min(48 << 20, max(16 << 20, 2 * vmem_need)))

    out = pl.pallas_call(
        _tmlp_kernel,
        out_shape=jax.ShapeDtypeStruct((N, O, OOp), out_dtype),
        grid_spec=pltpu.PrefetchScalarGridSpec(
            num_scalar_prefetch=0,
            grid=(grid,),
            in_specs=[
                pl.BlockSpec((bn, F, FF), lambda m: (m, 0, 0)),
                # Grid-invariant operands: constant index_map -> fetched once.
                pl.BlockSpec((O, F), lambda m: (0, 0)),
                pl.BlockSpec((FF, OOp), lambda m: (0, 0)),
                pl.BlockSpec((O, OOp), lambda m: (0, 0)),
            ],
            out_specs=pl.BlockSpec((bn, O, OOp), lambda m: (m, 0, 0)),
            scratch_shapes=[pltpu.VMEM((bn * O, FF), jnp.float32)],
        ),
        compiler_params=pltpu.CompilerParams(
            dimension_semantics=("parallel",),
            vmem_limit_bytes=vmem_limit,
        ),
    )(x3, A_c, wbc, bias2)

    # Free-ish slice/reshape back to the module's output layout.
    return out[:, :, :OO].reshape(N, O, O, O)


def tmlp_reference(x, A, B, C, bias):
    y = jnp.einsum('nijk,ri->nrjk', x, A)
    y = jnp.einsum('nijk,rj->nirk', y, B)
    y = jnp.einsum('nijk,rk->nijr', y, C)
    return y + bias


if __name__ == "__main__":
    N, in_feats, out_feats = 4, 16, 8

    key = jax.random.PRNGKey(0)
    kx, ka, kb, kc, kbias = jax.random.split(key, 5)

    x = jax.random.normal(kx, (N, in_feats, in_feats, in_feats), dtype=jnp.float32)
    # Linear(in_feats, out_feats).weight has shape (out_feats, in_feats)
    A = jax.random.normal(ka, (out_feats, in_feats), dtype=jnp.float32) * 0.1
    B = jax.random.normal(kb, (out_feats, in_feats), dtype=jnp.float32) * 0.1
    C = jax.random.normal(kc, (out_feats, in_feats), dtype=jnp.float32) * 0.1
    bias = jax.random.normal(kbias, (out_feats, out_feats, out_feats),
                             dtype=jnp.float32) * 0.1

    # N=4 -> a single 4-sample block (1 grid step); for large N the default
    # block_n=128 amortizes per-step overhead and fills the MXU M dimension.
    tmlp = jax.jit(tmlp_block)
    out = jax.block_until_ready(tmlp(x, A, B, C, bias))

    ref = tmlp_reference(x, A, B, C, bias)
    assert out.shape == (N, out_feats, out_feats, out_feats)
    # bf16 inputs with f32 accumulation vs f32 reference.
    assert jnp.allclose(out, ref, atol=5e-3, rtol=5e-3), "mismatch vs reference"

    print("KERNEL_OK")
</pallas_src>

<mosaic_0001>
module attributes {stable_mosaic.version = 11 : i64} {
  func.func @_tmlp_kernel(%arg0: i32, %arg1: memref<4x16x256xbf16, #tpu.memory_space<vmem>>, %arg2: memref<8x16xbf16, #tpu.memory_space<vmem>>, %arg3: memref<256x128xbf16, #tpu.memory_space<vmem>>, %arg4: memref<8x128xf32, #tpu.memory_space<vmem>>, %arg5: memref<4x8x128xf32, #tpu.memory_space<vmem>>, %arg6: memref<32x256xf32, #tpu.memory_space<vmem>>) attributes {dimension_semantics = [#tpu.dimension_semantics<parallel>], iteration_bounds = array<i64: 1>, scalar_prefetch = 0 : i64, scratch_operands = 1 : i64, tpu.core_type = #tpu.core_type<tc>, window_params = [{transform_indices = @transform_0, window_bounds = array<i64: 4, 16, 256>}, {pipeline_mode = #tpu.pipeline_mode<synchronous>, transform_indices = @transform_1, window_bounds = array<i64: 8, 16>}, {pipeline_mode = #tpu.pipeline_mode<synchronous>, transform_indices = @transform_2, window_bounds = array<i64: 256, 128>}, {pipeline_mode = #tpu.pipeline_mode<synchronous>, transform_indices = @transform_3, window_bounds = array<i64: 8, 128>}, {transform_indices = @transform_4, window_bounds = array<i64: 4, 8, 128>}]} {
    %c0 = arith.constant 0 : index
    %c0_0 = arith.constant 0 : index
    %0 = vector.load %arg2[%c0, %c0_0] : memref<8x16xbf16, #tpu.memory_space<vmem>>, vector<8x16xbf16>
    %c0_1 = arith.constant 0 : index
    %c0_2 = arith.constant 0 : index
    %1 = vector.load %arg3[%c0_1, %c0_2] : memref<256x128xbf16, #tpu.memory_space<vmem>>, vector<256x128xbf16>
    %c0_3 = arith.constant 0 : index
    %c0_4 = arith.constant 0 : index
    %2 = vector.load %arg4[%c0_3, %c0_4] : memref<8x128xf32, #tpu.memory_space<vmem>>, vector<8x128xf32>
    %c0_i32 = arith.constant 0 : i32
    %c8_i32 = arith.constant 8 : i32
    %3 = arith.muli %c0_i32, %c8_i32 : i32
    %4 = tpu.assume_multiple %3, 8 : i32
    %5 = arith.index_cast %c0_i32 : i32 to index
    %c0_5 = arith.constant 0 : index
    %c0_6 = arith.constant 0 : index
    %6 = vector.load %arg1[%5, %c0_5, %c0_6] : memref<4x16x256xbf16, #tpu.memory_space<vmem>>, vector<1x16x256xbf16>
    %7 = vector.shape_cast %6 : vector<1x16x256xbf16> to vector<16x256xbf16>
    %cst = arith.constant dense<0.000000e+00> : vector<8x256xf32>
    %8 = tpu.matmul %0, %7, %cst {dimension_numbers = #tpu.dot_dimension_numbers<[1], [0], [0], [1], [0, 0, 1, 1], [], []>} : vector<8x16xbf16>, vector<16x256xbf16>, vector<8x256xf32> -> vector<8x256xf32>
    %9 = arith.index_cast %4 : i32 to index
    %c0_7 = arith.constant 0 : index
    %10 = vector.load %arg6[%9, %c0_7] : memref<32x256xf32, #tpu.memory_space<vmem>>, vector<8x256xf32>
    tpu.vector_store %arg6[%9, %c0_7], %8 {strides = array<i32>} : memref<32x256xf32, #tpu.memory_space<vmem>>, vector<8x256xf32>,
    %c1_i32 = arith.constant 1 : i32
    %c8_i32_8 = arith.constant 8 : i32
    %11 = arith.muli %c1_i32, %c8_i32_8 : i32
    %12 = tpu.assume_multiple %11, 8 : i32
    %13 = arith.index_cast %c1_i32 : i32 to index
    %c0_9 = arith.constant 0 : index
    %c0_10 = arith.constant 0 : index
    %14 = vector.load %arg1[%13, %c0_9, %c0_10] : memref<4x16x256xbf16, #tpu.memory_space<vmem>>, vector<1x16x256xbf16>
    %15 = vector.shape_cast %14 : vector<1x16x256xbf16> to vector<16x256xbf16>
    %cst_11 = arith.constant dense<0.000000e+00> : vector<8x256xf32>
    %16 = tpu.matmul %0, %15, %cst_11 {dimension_numbers = #tpu.dot_dimension_numbers<[1], [0], [0], [1], [0, 0, 1, 1], [], []>} : vector<8x16xbf16>, vector<16x256xbf16>, vector<8x256xf32> -> vector<8x256xf32>
    %17 = arith.index_cast %12 : i32 to index
    %c0_12 = arith.constant 0 : index
    %18 = vector.load %arg6[%17, %c0_12] : memref<32x256xf32, #tpu.memory_space<vmem>>, vector<8x256xf32>
    tpu.vector_store %arg6[%17, %c0_12], %16 {strides = array<i32>} : memref<32x256xf32, #tpu.memory_space<vmem>>, vector<8x256xf32>,
    %c2_i32 = arith.constant 2 : i32
    %c8_i32_13 = arith.constant 8 : i32
    %19 = arith.muli %c2_i32, %c8_i32_13 : i32
    %20 = tpu.assume_multiple %19, 8 : i32
    %21 = arith.index_cast %c2_i32 : i32 to index
    %c0_14 = arith.constant 0 : index
    %c0_15 = arith.constant 0 : index
    %22 = vector.load %arg1[%21, %c0_14, %c0_15] : memref<4x16x256xbf16, #tpu.memory_space<vmem>>, vector<1x16x256xbf16>
    %23 = vector.shape_cast %22 : vector<1x16x256xbf16> to vector<16x256xbf16>
    %cst_16 = arith.constant dense<0.000000e+00> : vector<8x256xf32>
    %24 = tpu.matmul %0, %23, %cst_16 {dimension_numbers = #tpu.dot_dimension_numbers<[1], [0], [0], [1], [0, 0, 1, 1], [], []>} : vector<8x16xbf16>, vector<16x256xbf16>, vector<8x256xf32> -> vector<8x256xf32>
    %25 = arith.index_cast %20 : i32 to index
    %c0_17 = arith.constant 0 : index
    %26 = vector.load %arg6[%25, %c0_17] : memref<32x256xf32, #tpu.memory_space<vmem>>, vector<8x256xf32>
    tpu.vector_store %arg6[%25, %c0_17], %24 {strides = array<i32>} : memref<32x256xf32, #tpu.memory_space<vmem>>, vector<8x256xf32>,
    %c3_i32 = arith.constant 3 : i32
    %c8_i32_18 = arith.constant 8 : i32
    %27 = arith.muli %c3_i32, %c8_i32_18 : i32
    %28 = tpu.assume_multiple %27, 8 : i32
    %29 = arith.index_cast %c3_i32 : i32 to index
    %c0_19 = arith.constant 0 : index
    %c0_20 = arith.constant 0 : index
    %30 = vector.load %arg1[%29, %c0_19, %c0_20] : memref<4x16x256xbf16, #tpu.memory_space<vmem>>, vector<1x16x256xbf16>
    %31 = vector.shape_cast %30 : vector<1x16x256xbf16> to vector<16x256xbf16>
    %cst_21 = arith.constant dense<0.000000e+00> : vector<8x256xf32>
    %32 = tpu.matmul %0, %31, %cst_21 {dimension_numbers = #tpu.dot_dimension_numbers<[1], [0], [0], [1], [0, 0, 1, 1], [], []>} : vector<8x16xbf16>, vector<16x256xbf16>, vector<8x256xf32> -> vector<8x256xf32>
    %33 = arith.index_cast %28 : i32 to index
    %c0_22 = arith.constant 0 : index
    %34 = vector.load %arg6[%33, %c0_22] : memref<32x256xf32, #tpu.memory_space<vmem>>, vector<8x256xf32>
    tpu.vector_store %arg6[%33, %c0_22], %32 {strides = array<i32>} : memref<32x256xf32, #tpu.memory_space<vmem>>, vector<8x256xf32>,
    %c4_i32 = arith.constant 4 : i32
    %c0_23 = arith.constant 0 : index
    %c0_24 = arith.constant 0 : index
    %35 = vector.load %arg6[%c0_23, %c0_24] : memref<32x256xf32, #tpu.memory_space<vmem>>, vector<32x256xf32>
    %36 = arith.truncf %35 : vector<32x256xf32> to vector<32x256xbf16>
    %cst_25 = arith.constant dense<0.000000e+00> : vector<32x128xf32>
    %37 = tpu.matmul %36, %1, %cst_25 {dimension_numbers = #tpu.dot_dimension_numbers<[1], [0], [0], [1], [0, 0, 1, 1], [], []>} : vector<32x256xbf16>, vector<256x128xbf16>, vector<32x128xf32> -> vector<32x128xf32>
    %38 = vector.shape_cast %37 : vector<32x128xf32> to vector<4x8x128xf32>
    %39 = vector.shape_cast %2 : vector<8x128xf32> to vector<1x8x128xf32>
    %40 = vector.broadcast %39 : vector<1x8x128xf32> to vector<4x8x128xf32>
    %41 = arith.addf %38, %40 : vector<4x8x128xf32>
    %c0_26 = arith.constant 0 : index
    %c0_27 = arith.constant 0 : index
    %c0_28 = arith.constant 0 : index
    %42 = vector.load %arg5[%c0_26, %c0_27, %c0_28] : memref<4x8x128xf32, #tpu.memory_space<vmem>>, vector<4x8x128xf32>
    tpu.vector_store %arg5[%c0_26, %c0_27, %c0_28], %41 {strides = array<i32>} : memref<4x8x128xf32, #tpu.memory_space<vmem>>, vector<4x8x128xf32>,
    return
  }
  func.func @transform_0(%arg0: i32) -> (i32, i32, i32) {
    %c0_i32 = arith.constant 0 : i32
    %c0_i32_0 = arith.constant 0 : i32
    %c0_i32_1 = arith.constant 0 : i32
    return %arg0, %c0_i32, %c0_i32_0 : i32, i32, i32
  }
  func.func @transform_1(%arg0: i32) -> (i32, i32) {
    %c0_i32 = arith.constant 0 : i32
    %c0_i32_0 = arith.constant 0 : i32
    %c0_i32_1 = arith.constant 0 : i32
    return %c0_i32, %c0_i32_0 : i32, i32
  }
  func.func @transform_2(%arg0: i32) -> (i32, i32) {
    %c0_i32 = arith.constant 0 : i32
    %c0_i32_0 = arith.constant 0 : i32
    %c0_i32_1 = arith.constant 0 : i32
    return %c0_i32, %c0_i32_0 : i32, i32
  }
  func.func @transform_3(%arg0: i32) -> (i32, i32) {
    %c0_i32 = arith.constant 0 : i32
    %c0_i32_0 = arith.constant 0 : i32
    %c0_i32_1 = arith.constant 0 : i32
    return %c0_i32, %c0_i32_0 : i32, i32
  }
  func.func @transform_4(%arg0: i32) -> (i32, i32, i32) {
    %c0_i32 = arith.constant 0 : i32
    %c0_i32_0 = arith.constant 0 : i32
    %c0_i32_1 = arith.constant 0 : i32
    return %arg0, %c0_i32, %c0_i32_0 : i32, i32, i32
  }
}

</mosaic_0001>

<bundles_post_ra>
// kernel: tmlp_block.1
= control target key start
LH: loop header
LB: loop body
LE: loop exit
PB: predicated region body
PF: predicated region fallthrough
CT: control target
= control target key end

     0   :  { %v554_v1 = vmov 0   ;;  %vm64_vm0 = vcmask 130048   ;;  %s674_s0 = inlined_call_operand.vmem [shape: bf16[4,16,256], index: 0, kind: input, shape index: {}]   ;;  %s675_s1 = inlined_call_operand.vmem [shape: bf16[8,16], index: 1, kind: input, shape index: {}]   ;;  %s676_s2 = inlined_call_operand.vmem [shape: bf16[256,128], index: 2, kind: input, shape index: {}]   ;;  %s677_s3 = inlined_call_operand.vmem [shape: f32[8,128], index: 3, kind: input, shape index: {}]   ;;  %s678_s4 = inlined_call_operand.vmem [shape: f32[4,8,128], index: 4, kind: output, shape index: {}]  }
   0x1   :  { %v526_v0 = vld [vmem:[%s674_s0 + $0x4] ss:$8 sps:$4 sm:$0xff]   ;;  %100 = vmatprep.mubr.bf16.mxu1 %v554_v1  ;;  %v528_v2 = vld [vmem:[%s674_s0] ss:$8 sps:$4 sm:$0xff]   ;;  %v531_v4 = vld [vmem:[%s674_s0 + $0x14] ss:$8 sps:$4 sm:$0xff]  }
   0x2   :  { %68 = vmatprep.subr.bf16.mxu1 %v526_v0  ;;  %v18_v3 = vld [vmem:[%s675_s1] sm:$0xf]  ;;  %v529_v5 = vld [vmem:[%s674_s0 + $0x10] ss:$8 sps:$4 sm:$0xff]   ;;  %v534_v6 = vld [vmem:[%s674_s0 + $0x24] ss:$8 sps:$4 sm:$0xff]  }
   0x3   :  { %69 = vmatpush1.bf16.msra.mxu1 %v528_v2  ;;  %v538_v7 = vld [vmem:[%s676_s2 + $0x40] sm:$0xff]   ;;  %v540_v9 = vld [vmem:[%s676_s2 + $0x48] sm:$0xff]   ;;  %v542_v11 = vld [vmem:[%s676_s2 + $0x50] sm:$0xff]  }
   0x4   :  { %127 = vmatprep.subr.bf16.mxu1 %v531_v4  ;;  %v539_v8 = vld [vmem:[%s676_s2] sm:$0xff]   ;;  %497 = vmatprep.subr.bf16.mxu0 %v538_v7  ;;  %v541_v10 = vld [vmem:[%s676_s2 + $0x8] sm:$0xff]   ;;  %v537_v13 = vld [vmem:[%s674_s0 + $0x34] ss:$8 sps:$4 sm:$0xff]  }
   0x5   :  { %498 = vmatpush3.bf16.msra.mxu0 %v539_v8  ;;  %v532_v12 = vld [vmem:[%s674_s0 + $0x20] ss:$8 sps:$4 sm:$0xff]   ;;  %v543_v14 = vld [vmem:[%s676_s2 + $0x10] sm:$0xff]   ;;  %v544_v15 = vld [vmem:[%s676_s2 + $0x58] sm:$0xff]  }
   0x6   :  { %465 = vmatmul.mubr.msk.bf16.vlgmr.msra.gmra.mrb[0].mxu1 %vm64_vm0, %v18_v3  ;;  %499 = vmatprep.subr.bf16.mxu0 %v540_v9  ;;  %v545_v16 = vld [vmem:[%s676_s2 + $0x18] sm:$0xff]   ;;  %v546_v17 = vld [vmem:[%s676_s2 + $0x60] sm:$0xff]   ;;  %v548_v20 = vld [vmem:[%s676_s2 + $0x68] sm:$0xff]  }
   0x7   :  { %128 = vmatpush1.bf16.msra.mxu1 %v529_v5  ;;  %159 = vmatprep.mubr.bf16.mxu1 %v554_v1  ;;  %v535_v18 = vld [vmem:[%s674_s0 + $0x30] ss:$8 sps:$4 sm:$0xff]   ;;  %v547_v19 = vld [vmem:[%s676_s2 + $0x20] sm:$0xff]   ;;  %v549_v21 = vld [vmem:[%s676_s2 + $0x28] sm:$0xff]  }
   0x8   :  { %186 = vmatprep.subr.bf16.mxu1 %v534_v6  ;;  %v550_v22 = vld [vmem:[%s676_s2 + $0x70] sm:$0xff]   ;;  %v552_v24 = vld [vmem:[%s676_s2 + $0x78] sm:$0xff]   ;;  %v51_v47 = vld [vmem:[%s677_s3] sm:$0xff] }
   0x9   :  { %500 = vmatpush3.bf16.msra.mxu0 %v541_v10  ;;  %v551_v23 = vld [vmem:[%s676_s2 + $0x30] sm:$0xff]   ;;  %v553_v25 = vld [vmem:[%s676_s2 + $0x38] sm:$0xff]  }
   0xa   :  { %501 = vmatprep.subr.bf16.mxu0 %v542_v11 }
   0xd   :  { %502 = vmatpush3.bf16.msra.mxu0 %v543_v14 }
   0xe   :  { %470 = vmatmul.mubr.msk.bf16.vlgmr.msra.gmra.mrb[4].mxu1 %vm64_vm0, %v18_v3  ;;  %503 = vmatprep.subr.bf16.mxu0 %v544_v15 }
   0xf   :  { %187 = vmatpush1.bf16.msra.mxu1 %v532_v12  ;;  %218 = vmatprep.mubr.bf16.mxu1 %v554_v1 }
  0x10   :  { %245 = vmatprep.subr.bf16.mxu1 %v537_v13 }
  0x11   :  { %504 = vmatpush3.bf16.msra.mxu0 %v545_v16 }
  0x12   :  { %505 = vmatprep.subr.bf16.mxu0 %v546_v17 }
  0x15   :  { %506 = vmatpush3.bf16.msra.mxu0 %v547_v19 }
  0x16   :  { %475 = vmatmul.mubr.msk.bf16.vlgmr.msra.gmra.mrb[8].mxu1 %vm64_vm0, %v18_v3  ;;  %507 = vmatprep.subr.bf16.mxu0 %v548_v20 }
  0x17   :  { %246 = vmatpush1.bf16.msra.mxu1 %v535_v18  ;;  %277 = vmatprep.mubr.bf16.mxu1 %v554_v1 }
  0x19   :  { %508 = vmatpush3.bf16.msra.mxu0 %v549_v21 }
  0x1a   :  { %509 = vmatprep.subr.bf16.mxu0 %v550_v22 }
  0x1d   :  { %510 = vmatpush3.bf16.msra.mxu0 %v551_v23 }
  0x1e   :  { %480 = vmatmul.mubr.msk.bf16.vlgmr.msra.gmra.mrb[12].mxu1 %vm64_vm0, %v18_v3  ;;  %511 = vmatprep.subr.bf16.mxu0 %v552_v24 }
  0x21   :  { %512 = vmatpush3.bf16.msra.mxu0 %v553_v25 }
  0xd9   :  { %v102_v26 = vpop.f32.mrb[0].mxu1 }
  0xda   :  { %v104_v27 = vpop.f32.mrb[1].mxu1 }
  0xdb   :  { %v106_v28 = vpop.f32.mrb[2].mxu1 }
  0xdc   :  { %v107_v29 = vpop.f32.mrb[3].mxu1 }
  0xe1   :  { %v161_v30 = vpop.f32.mrb[4].mxu1 }
  0xe2   :  { %v299_v31 = vpack.c.bf16 %v161_v30, %v102_v26  ;;  %v163_v32 = vpop.f32.mrb[5].mxu1 }
  0xe3   :  { %v165_v33 = vpop.f32.mrb[6].mxu1  ;;  %v300_v34 = vpack.c.bf16 %v163_v32, %v104_v27 }
  0xe4   :  { %v166_v35 = vpop.f32.mrb[7].mxu1 }
  0xe5   :  { %431 = vmatprep.mubr.bf16.mxu0 %v300_v34 }
  0xe6   :  { %432 = vmatmul.mubr.bf16.vlgmr.msra.gmra.mrb[0].mxu0 %v299_v31 }
  0xe9   :  { %v220_v36 = vpop.f32.mrb[8].mxu1 }
  0xea   :  { %v222_v37 = vpop.f32.mrb[9].mxu1 }
  0xeb   :  { %v224_v38 = vpop.f32.mrb[10].mxu1 }
  0xec   :  { %v225_v39 = vpop.f32.mrb[11].mxu1 }
  0xf1   :  { %v279_v40 = vpop.f32.mrb[12].mxu1 }
  0xf2   :  { %v301_v41 = vpack.c.bf16 %v279_v40, %v220_v36  ;;  %v281_v42 = vpop.f32.mrb[13].mxu1 }
  0xf3   :  { %v302_v43 = vpack.c.bf16 %v281_v42, %v222_v37  ;;  %v283_v44 = vpop.f32.mrb[14].mxu1 }
  0xf4   :  { %v284_v45 = vpop.f32.mrb[15].mxu1 }
  0xf5   :  { %439 = vmatprep.mubr.bf16.mxu0 %v302_v43 }
  0xf6   :  { %440 = vmatmul.mubr.bf16.gmra.mrb[4].mxu0 %v301_v41 }
 0x1b9   :  { %v513_v46 = vpop.f32.mrb[0].mxu0 }
 0x1ba   :  { %v514_v48 = vpop.f32.mrb[1].mxu0 }
 0x1bb   :  { %v515_v49 = vadd.f32 %v514_v48, %v513_v46  ;;  %v516_v50 = vpop.f32.mrb[2].mxu0 }
 0x1bc   :  { %v517_v51 = vpop.f32.mrb[3].mxu0 }
 0x1bd   :  { %v448_v52 = vadd.f32 %v515_v49, %v51_v47  ;;  %v518_v53 = vadd.f32 %v517_v51, %v516_v50 }
 0x1bf   :  { %452 = vst [vmem:[%s678_s4] sm:$0xff] %v448_v52  ;;  %v449_v54 = vadd.f32 %v518_v53, %v51_v47 }
 0x1c1   :  { %453 = vst [vmem:[%s678_s4 + $0x8] sm:$0xff] %v449_v54 }
 0x1c9   :  { %v519_v55 = vpop.f32.mrb[4].mxu0 }
 0x1ca   :  { %v520_v56 = vpop.f32.mrb[5].mxu0 }
 0x1cb   :  { %v521_v57 = vadd.f32 %v520_v56, %v519_v55  ;;  %v522_v58 = vpop.f32.mrb[6].mxu0 }
 0x1cc   :  { %v523_v59 = vpop.f32.mrb[7].mxu0 }
 0x1cd   :  { %v450_v60 = vadd.f32 %v521_v57, %v51_v47  ;;  %v524_v61 = vadd.f32 %v523_v59, %v522_v58 }
 0x1cf   :  { %454 = vst [vmem:[%s678_s4 + $0x10] sm:$0xff] %v450_v60  ;;  %v451_v62 = vadd.f32 %v524_v61, %v51_v47 }
 0x1d1   :  { %455 = vst [vmem:[%s678_s4 + $0x18] sm:$0xff] %v451_v62 }

</bundles_post_ra>
